<compile_context>
chip_gen: v7x
topology: tpu7x:2x2x1
jax: 0.10.0
libtpu: 0.0.40
codegen_flags: <defaults>
</compile_context>

<pallas_src>
import jax
import jax.numpy as jnp
import numpy as np
from jax import lax
from jax.experimental import pallas as pl
from jax.experimental.pallas import tpu as pltpu

BN_EPS = 1e-5


def _pick_tile(dhw):
    for t in (8192, 4096, 2048, 1024, 512, 256, 128):
        if dhw % t == 0:
            return t
    return dhw  # full-extent block (allowed even when not a multiple of 128)


def _hw_taps(x_pad, H, W, offsets):
    """x_pad: (N, Cin, Dp, Hp, Wp) -> (N, 9*Cin, Dp*H*W).

    Rows ordered (kh, kw)-major, cin-minor (matches the reshaped weights);
    the depth axis stays padded — depth taps are sliced inside the kernel.
    """
    taps = [x_pad[:, :, :, dh:dh + H, dw:dw + W] for (dh, dw) in offsets]
    q = jnp.concatenate(taps, axis=1)                  # (N, 9*Cin, Dp, H, W)
    n, r, dp = q.shape[0], q.shape[1], q.shape[2]
    return q.reshape(n, r, dp * H * W)


def _w_per_kd(w_oidhw):
    """(Cout, Cin, 3, 3, 3) -> (3(kd), Cout, 9*Cin), columns (kh, kw, cin)."""
    cout = w_oidhw.shape[0]
    wt = jnp.transpose(w_oidhw, (2, 0, 3, 4, 1))       # (kd, Cout, kh, kw, Cin)
    return wt.reshape(3, cout, -1)


def double_conv1_forward(x_ncdhw, params):
    N, Cin, D, H, W = x_ncdhw.shape
    Cout = params["w1"].shape[0]
    C3 = 3 * Cout
    HW = H * W
    DHW = D * HW
    DpHW = (D + 4) * HW
    M = N * DHW
    K9 = 9 * Cin

    # ---- wrapper prep (bf16 end to end; no f32 im2col, no K padding) ----
    x_b = x_ncdhw.astype(jnp.bfloat16)
    x_pad = jnp.pad(x_b, ((0, 0), (0, 0), (2, 2), (2, 2), (2, 2)))

    # (kh, kw) taps only; depth taps are taken inside kernel 1.
    offs1 = [(kh + 1, kw + 1) for kh in range(3) for kw in range(3)]   # pad=1, dil=1
    offs3 = [(2 * kh, 2 * kw) for kh in range(3) for kw in range(3)]   # pad=2, dil=2
    q12 = _hw_taps(x_pad, H, W, offs1)      # (N, 9*Cin, Dp*H*W), shared by br1+br2
    q3 = _hw_taps(x_pad, H, W, offs3)       # (N, 9*Cin, Dp*H*W)

    # Branches 1 and 2 share q12 -> fuse their weights into one matmul.
    w12 = jnp.concatenate([_w_per_kd(params["w1"]), _w_per_kd(params["w2"])],
                          axis=1).astype(jnp.bfloat16)   # (3, 2*Cout, 9*Cin)
    w3 = _w_per_kd(params["w3"]).astype(jnp.bfloat16)    # (3, Cout, 9*Cin)

    # ----------------- kernel 1: conv + per-sample BN statistics -----------------
    def conv_stats_kernel(q12_ref, q3_ref, w12_ref, w3_ref, y_ref, st_ref):
        y12 = jnp.zeros((2 * Cout, DHW), jnp.float32)
        y3 = jnp.zeros((Cout, DHW), jnp.float32)
        for kd in range(3):  # depth taps = static lane-offset slices (in-kernel im2col)
            o1 = (kd + 1) * HW          # branch 1/2: pad=1, dil=1
            o3 = 2 * kd * HW            # branch 3:   pad=2, dil=2
            y12 = y12 + jnp.dot(w12_ref[kd], q12_ref[0, :, o1:o1 + DHW],
                                preferred_element_type=jnp.float32)
            y3 = y3 + jnp.dot(w3_ref[kd], q3_ref[0, :, o3:o3 + DHW],
                              preferred_element_type=jnp.float32)
        # Sublane-slice stores (no concatenate copy); bf16 intermediate.
        y_ref[0, 0:2 * Cout, :] = y12.astype(y_ref.dtype)
        y_ref[0, 2 * Cout:C3, :] = y3.astype(y_ref.dtype)
        # Per-branch stats before any relayout; per-sample partial outputs keep
        # the grid axis "parallel" (no resident accumulator, no pl.when init).
        ssum = jnp.concatenate([jnp.sum(y12, axis=1, keepdims=True),
                                jnp.sum(y3, axis=1, keepdims=True)], axis=0)
        sssq = jnp.concatenate([jnp.sum(y12 * y12, axis=1, keepdims=True),
                                jnp.sum(y3 * y3, axis=1, keepdims=True)], axis=0)
        st_ref[0] = jnp.concatenate([ssum, sssq], axis=1)   # (C3, 2)

    flops1 = 2 * M * (27 * Cin) * C3
    bytes1 = q12.size * 2 + q3.size * 2 + M * C3 * 2
    y_raw, stats = pl.pallas_call(
        conv_stats_kernel,
        grid=(N,),
        in_specs=[
            pl.BlockSpec((1, K9, DpHW), lambda n: (n, 0, 0)),
            pl.BlockSpec((1, K9, DpHW), lambda n: (n, 0, 0)),
            pl.BlockSpec((3, 2 * Cout, K9), lambda n: (0, 0, 0)),
            pl.BlockSpec((3, Cout, K9), lambda n: (0, 0, 0)),
        ],
        out_specs=(
            pl.BlockSpec((1, C3, DHW), lambda n: (n, 0, 0)),
            pl.BlockSpec((1, C3, 2), lambda n: (n, 0, 0)),
        ),
        out_shape=(
            jax.ShapeDtypeStruct((N, C3, DHW), jnp.bfloat16),
            jax.ShapeDtypeStruct((N, C3, 2), jnp.float32),
        ),
        compiler_params=pltpu.CompilerParams(
            dimension_semantics=("parallel",),
            vmem_limit_bytes=32 * 1024 * 1024),
        cost_estimate=pl.CostEstimate(
            flops=flops1, transcendentals=0, bytes_accessed=bytes1),
    )(q12, q3, w12, w3)

    # --- tiny host fold: BN (training mode, biased var) -> per-channel scale/shift ---
    # NOTE: E[y^2] - E[y]^2 in f32 can cancel for very large M; fine at these sizes.
    csum = jnp.sum(stats[:, :, 0], axis=0)
    cssq = jnp.sum(stats[:, :, 1], axis=0)
    mean = csum / M
    var = jnp.maximum(cssq / M - mean * mean, 0.0)
    gamma = jnp.concatenate([params["g1"], params["g2"], params["g3"]])
    beta = jnp.concatenate([params["be1"], params["be2"], params["be3"]])
    inv = lax.rsqrt(var + BN_EPS)
    scale = (gamma * inv).reshape(C3, 1).astype(jnp.float32)
    shift = (beta - mean * gamma * inv).reshape(C3, 1).astype(jnp.float32)

    w4 = params["w4"][:, :, 0, 0, 0].astype(jnp.float32)   # (Cout, 3*Cout)
    b4 = params["b4"].reshape(Cout, 1).astype(jnp.float32)

    # ------ kernel 2: folded BN affine + ReLU + 1x1 conv, lane-dense NC(DHW) out ------
    def bn_relu_proj_kernel(y_ref, s_ref, t_ref, w4_ref, b4_ref, out_ref):
        z = jnp.maximum(y_ref[0].astype(jnp.float32) * s_ref[...] + t_ref[...], 0.0)
        out = jnp.dot(w4_ref[...], z, preferred_element_type=jnp.float32) + b4_ref[...]
        out_ref[0] = out.astype(out_ref.dtype)

    TM = _pick_tile(DHW)
    bpn = DHW // TM
    flops2 = 2 * M * C3 * Cout
    bytes2 = M * C3 * 2 + M * Cout * 4
    out = pl.pallas_call(
        bn_relu_proj_kernel,
        grid=(N, bpn),
        in_specs=[
            pl.BlockSpec((1, C3, TM), lambda n, j: (n, 0, j)),
            pl.BlockSpec((C3, 1), lambda n, j: (0, 0)),
            pl.BlockSpec((C3, 1), lambda n, j: (0, 0)),
            pl.BlockSpec((Cout, C3), lambda n, j: (0, 0)),
            pl.BlockSpec((Cout, 1), lambda n, j: (0, 0)),
        ],
        out_specs=pl.BlockSpec((1, Cout, TM), lambda n, j: (n, 0, j)),
        out_shape=jax.ShapeDtypeStruct((N, Cout, DHW), jnp.float32),
        compiler_params=pltpu.CompilerParams(
            dimension_semantics=("parallel", "parallel"),
            vmem_limit_bytes=32 * 1024 * 1024),
        cost_estimate=pl.CostEstimate(
            flops=flops2, transcendentals=0, bytes_accessed=bytes2),
    )(y_raw, scale, shift, w4, b4)

    return out.reshape(N, Cout, D, H, W)   # already NCDHW ordered


# ---------------------------------------------------------------------------
# Pure-JAX reference (correctness check only; includes the conv biases)
# ---------------------------------------------------------------------------
def reference_forward(x, params):
    dn = lax.conv_dimension_numbers(x.shape, params["w1"].shape,
                                    ("NCDHW", "OIDHW", "NCDHW"))

    def conv_bn_relu(w, b, g, be, pad, dil):
        y = lax.conv_general_dilated(
            x, w, window_strides=(1, 1, 1),
            padding=((pad, pad),) * 3, rhs_dilation=(dil, dil, dil),
            dimension_numbers=dn, precision=lax.Precision.HIGHEST)
        y = y + b.reshape(1, -1, 1, 1, 1)
        mean = jnp.mean(y, axis=(0, 2, 3, 4), keepdims=True)
        var = jnp.mean((y - mean) ** 2, axis=(0, 2, 3, 4), keepdims=True)
        y = (y - mean) * lax.rsqrt(var + BN_EPS)
        y = y * g.reshape(1, -1, 1, 1, 1) + be.reshape(1, -1, 1, 1, 1)
        return jnp.maximum(y, 0.0)

    y1 = conv_bn_relu(params["w1"], params["b1"], params["g1"], params["be1"], 1, 1)
    y2 = conv_bn_relu(params["w2"], params["b2"], params["g2"], params["be2"], 1, 1)
    y3 = conv_bn_relu(params["w3"], params["b3"], params["g3"], params["be3"], 2, 2)
    ycat = jnp.concatenate([y1, y2, y3], axis=1)
    out = lax.conv_general_dilated(
        ycat, params["w4"], window_strides=(1, 1, 1),
        padding=((0, 0),) * 3, dimension_numbers=dn,
        precision=lax.Precision.HIGHEST)
    return out + params["b4"].reshape(1, -1, 1, 1, 1)


# ---------------------------------------------------------------------------
def make_params(key, in_channels, out_channels):
    ks = jax.random.split(key, 8)
    scale = 0.1

    def conv_w(k):
        return (scale * jax.random.normal(
            k, (out_channels, in_channels, 3, 3, 3))).astype(jnp.float32)

    def bias(k, c):
        return (scale * jax.random.normal(k, (c,))).astype(jnp.float32)

    return dict(
        w1=conv_w(ks[0]), b1=bias(ks[1], out_channels),
        g1=jnp.ones((out_channels,), jnp.float32),
        be1=jnp.zeros((out_channels,), jnp.float32),
        w2=conv_w(ks[2]), b2=bias(ks[3], out_channels),
        g2=jnp.ones((out_channels,), jnp.float32),
        be2=jnp.zeros((out_channels,), jnp.float32),
        w3=conv_w(ks[4]), b3=bias(ks[5], out_channels),
        g3=jnp.ones((out_channels,), jnp.float32),
        be3=jnp.zeros((out_channels,), jnp.float32),
        w4=(scale * jax.random.normal(
            ks[6], (out_channels, out_channels * 3, 1, 1, 1))).astype(jnp.float32),
        b4=bias(ks[7], out_channels),
    )


def _round_bf16(a):
    return a.astype(jnp.bfloat16).astype(jnp.float32)


if __name__ == "__main__":
    key = jax.random.PRNGKey(0)
    kx, kp = jax.random.split(key)

    N, Cin, Cout, D, H, W = 2, 4, 8, 8, 8, 8
    x = jax.random.normal(kx, (N, Cin, D, H, W), dtype=jnp.float32)
    params = make_params(kp, Cin, Cout)

    # Pre-round the conv-matmul operands to bf16 so the kernel's bf16 MXU path
    # and the f32 reference see identical values (the cast is then lossless).
    x = _round_bf16(x)
    for name in ("w1", "w2", "w3"):
        params[name] = _round_bf16(params[name])

    fwd = jax.jit(double_conv1_forward)
    out = jax.block_until_ready(fwd(x, params))
    assert out.shape == (N, Cout, D, H, W)

    ref = jax.block_until_ready(reference_forward(x, params))
    # The bf16 (3*Cout, M) intermediate between the two kernels adds ~1e-3
    # relative noise at the output (BN statistics themselves stay f32).
    np.testing.assert_allclose(np.asarray(out), np.asarray(ref), atol=1e-2, rtol=1e-2)

    print("KERNEL_OK")
</pallas_src>

<mosaic_0001>
module attributes {stable_mosaic.version = 11 : i64} {
  func.func @conv_stats_kernel(%arg0: i32, %arg1: memref<1x36x768xbf16, #tpu.memory_space<vmem>>, %arg2: memref<1x36x768xbf16, #tpu.memory_space<vmem>>, %arg3: memref<3x16x36xbf16, #tpu.memory_space<vmem>>, %arg4: memref<3x8x36xbf16, #tpu.memory_space<vmem>>, %arg5: memref<1x24x512xbf16, #tpu.memory_space<vmem>>, %arg6: memref<1x24x2xf32, #tpu.memory_space<vmem>>) attributes {dimension_semantics = [#tpu.dimension_semantics<parallel>], iteration_bounds = array<i64: 2>, scalar_prefetch = 0 : i64, scratch_operands = 0 : i64, tpu.core_type = #tpu.core_type<tc>, window_params = [{transform_indices = @transform_0, window_bounds = array<i64: 1, 36, 768>}, {transform_indices = @transform_1, window_bounds = array<i64: 1, 36, 768>}, {pipeline_mode = #tpu.pipeline_mode<synchronous>, transform_indices = @transform_2, window_bounds = array<i64: 3, 16, 36>}, {pipeline_mode = #tpu.pipeline_mode<synchronous>, transform_indices = @transform_3, window_bounds = array<i64: 3, 8, 36>}, {transform_indices = @transform_4, window_bounds = array<i64: 1, 24, 512>}, {transform_indices = @transform_5, window_bounds = array<i64: 1, 24, 2>}]} {
    %cst = arith.constant 0.000000e+00 : f32
    %0 = vector.broadcast %cst : f32 to vector<16x512xf32>
    %cst_0 = arith.constant 0.000000e+00 : f32
    %1 = vector.broadcast %cst_0 : f32 to vector<8x512xf32>
    %c0 = arith.constant 0 : index
    %c0_1 = arith.constant 0 : index
    %c0_2 = arith.constant 0 : index
    %2 = vector.load %arg3[%c0, %c0_1, %c0_2] : memref<3x16x36xbf16, #tpu.memory_space<vmem>>, vector<1x16x36xbf16>
    %3 = vector.shape_cast %2 : vector<1x16x36xbf16> to vector<16x36xbf16>
    %c0_3 = arith.constant 0 : index
    %c0_4 = arith.constant 0 : index
    %c64 = arith.constant 64 : index
    %4 = vector.load %arg1[%c0_3, %c0_4, %c64] : memref<1x36x768xbf16, #tpu.memory_space<vmem>>, vector<1x36x512xbf16>
    %5 = vector.shape_cast %4 : vector<1x36x512xbf16> to vector<36x512xbf16>
    %cst_5 = arith.constant dense<0.000000e+00> : vector<16x512xf32>
    %6 = tpu.matmul %3, %5, %cst_5 {dimension_numbers = #tpu.dot_dimension_numbers<[1], [0], [0], [1], [0, 0, 1, 1], [], []>} : vector<16x36xbf16>, vector<36x512xbf16>, vector<16x512xf32> -> vector<16x512xf32>
    %7 = arith.addf %0, %6 : vector<16x512xf32>
    %c0_6 = arith.constant 0 : index
    %c0_7 = arith.constant 0 : index
    %c0_8 = arith.constant 0 : index
    %8 = vector.load %arg4[%c0_6, %c0_7, %c0_8] : memref<3x8x36xbf16, #tpu.memory_space<vmem>>, vector<1x8x36xbf16>
    %9 = vector.shape_cast %8 : vector<1x8x36xbf16> to vector<8x36xbf16>
    %c0_9 = arith.constant 0 : index
    %c0_10 = arith.constant 0 : index
    %c0_11 = arith.constant 0 : index
    %10 = vector.load %arg2[%c0_9, %c0_10, %c0_11] : memref<1x36x768xbf16, #tpu.memory_space<vmem>>, vector<1x36x512xbf16>
    %11 = vector.shape_cast %10 : vector<1x36x512xbf16> to vector<36x512xbf16>
    %cst_12 = arith.constant dense<0.000000e+00> : vector<8x512xf32>
    %12 = tpu.matmul %9, %11, %cst_12 {dimension_numbers = #tpu.dot_dimension_numbers<[1], [0], [0], [1], [0, 0, 1, 1], [], []>} : vector<8x36xbf16>, vector<36x512xbf16>, vector<8x512xf32> -> vector<8x512xf32>
    %13 = arith.addf %1, %12 : vector<8x512xf32>
    %c1 = arith.constant 1 : index
    %c0_13 = arith.constant 0 : index
    %c0_14 = arith.constant 0 : index
    %14 = vector.load %arg3[%c1, %c0_13, %c0_14] : memref<3x16x36xbf16, #tpu.memory_space<vmem>>, vector<1x16x36xbf16>
    %15 = vector.shape_cast %14 : vector<1x16x36xbf16> to vector<16x36xbf16>
    %c0_15 = arith.constant 0 : index
    %c0_16 = arith.constant 0 : index
    %c128 = arith.constant 128 : index
    %16 = vector.load %arg1[%c0_15, %c0_16, %c128] : memref<1x36x768xbf16, #tpu.memory_space<vmem>>, vector<1x36x512xbf16>
    %17 = vector.shape_cast %16 : vector<1x36x512xbf16> to vector<36x512xbf16>
    %cst_17 = arith.constant dense<0.000000e+00> : vector<16x512xf32>
    %18 = tpu.matmul %15, %17, %cst_17 {dimension_numbers = #tpu.dot_dimension_numbers<[1], [0], [0], [1], [0, 0, 1, 1], [], []>} : vector<16x36xbf16>, vector<36x512xbf16>, vector<16x512xf32> -> vector<16x512xf32>
    %19 = arith.addf %7, %18 : vector<16x512xf32>
    %c1_18 = arith.constant 1 : index
    %c0_19 = arith.constant 0 : index
    %c0_20 = arith.constant 0 : index
    %20 = vector.load %arg4[%c1_18, %c0_19, %c0_20] : memref<3x8x36xbf16, #tpu.memory_space<vmem>>, vector<1x8x36xbf16>
    %21 = vector.shape_cast %20 : vector<1x8x36xbf16> to vector<8x36xbf16>
    %c0_21 = arith.constant 0 : index
    %c0_22 = arith.constant 0 : index
    %c128_23 = arith.constant 128 : index
    %22 = vector.load %arg2[%c0_21, %c0_22, %c128_23] : memref<1x36x768xbf16, #tpu.memory_space<vmem>>, vector<1x36x512xbf16>
    %23 = vector.shape_cast %22 : vector<1x36x512xbf16> to vector<36x512xbf16>
    %cst_24 = arith.constant dense<0.000000e+00> : vector<8x512xf32>
    %24 = tpu.matmul %21, %23, %cst_24 {dimension_numbers = #tpu.dot_dimension_numbers<[1], [0], [0], [1], [0, 0, 1, 1], [], []>} : vector<8x36xbf16>, vector<36x512xbf16>, vector<8x512xf32> -> vector<8x512xf32>
    %25 = arith.addf %13, %24 : vector<8x512xf32>
    %c2 = arith.constant 2 : index
    %c0_25 = arith.constant 0 : index
    %c0_26 = arith.constant 0 : index
    %26 = vector.load %arg3[%c2, %c0_25, %c0_26] : memref<3x16x36xbf16, #tpu.memory_space<vmem>>, vector<1x16x36xbf16>
    %27 = vector.shape_cast %26 : vector<1x16x36xbf16> to vector<16x36xbf16>
    %c0_27 = arith.constant 0 : index
    %c0_28 = arith.constant 0 : index
    %c192 = arith.constant 192 : index
    %28 = vector.load %arg1[%c0_27, %c0_28, %c192] : memref<1x36x768xbf16, #tpu.memory_space<vmem>>, vector<1x36x512xbf16>
    %29 = vector.shape_cast %28 : vector<1x36x512xbf16> to vector<36x512xbf16>
    %cst_29 = arith.constant dense<0.000000e+00> : vector<16x512xf32>
    %30 = tpu.matmul %27, %29, %cst_29 {dimension_numbers = #tpu.dot_dimension_numbers<[1], [0], [0], [1], [0, 0, 1, 1], [], []>} : vector<16x36xbf16>, vector<36x512xbf16>, vector<16x512xf32> -> vector<16x512xf32>
    %31 = arith.addf %19, %30 : vector<16x512xf32>
    %c2_30 = arith.constant 2 : index
    %c0_31 = arith.constant 0 : index
    %c0_32 = arith.constant 0 : index
    %32 = vector.load %arg4[%c2_30, %c0_31, %c0_32] : memref<3x8x36xbf16, #tpu.memory_space<vmem>>, vector<1x8x36xbf16>
    %33 = vector.shape_cast %32 : vector<1x8x36xbf16> to vector<8x36xbf16>
    %c0_33 = arith.constant 0 : index
    %c0_34 = arith.constant 0 : index
    %c256 = arith.constant 256 : index
    %34 = vector.load %arg2[%c0_33, %c0_34, %c256] : memref<1x36x768xbf16, #tpu.memory_space<vmem>>, vector<1x36x512xbf16>
    %35 = vector.shape_cast %34 : vector<1x36x512xbf16> to vector<36x512xbf16>
    %cst_35 = arith.constant dense<0.000000e+00> : vector<8x512xf32>
    %36 = tpu.matmul %33, %35, %cst_35 {dimension_numbers = #tpu.dot_dimension_numbers<[1], [0], [0], [1], [0, 0, 1, 1], [], []>} : vector<8x36xbf16>, vector<36x512xbf16>, vector<8x512xf32> -> vector<8x512xf32>
    %37 = arith.addf %25, %36 : vector<8x512xf32>
    %38 = arith.truncf %31 : vector<16x512xf32> to vector<16x512xbf16>
    %c0_36 = arith.constant 0 : index
    %c0_37 = arith.constant 0 : index
    %c0_38 = arith.constant 0 : index
    %39 = vector.load %arg5[%c0_36, %c0_37, %c0_38] : memref<1x24x512xbf16, #tpu.memory_space<vmem>>, vector<1x16x512xbf16>
    %40 = vector.shape_cast %39 : vector<1x16x512xbf16> to vector<16x512xbf16>
    %41 = vector.shape_cast %38 : vector<16x512xbf16> to vector<1x16x512xbf16>
    tpu.vector_store %arg5[%c0_36, %c0_37, %c0_38], %41 {strides = array<i32>} : memref<1x24x512xbf16, #tpu.memory_space<vmem>>, vector<1x16x512xbf16>,
    %42 = arith.truncf %37 : vector<8x512xf32> to vector<8x512xbf16>
    %c0_39 = arith.constant 0 : index
    %c16 = arith.constant 16 : index
    %c0_40 = arith.constant 0 : index
    %43 = vector.load %arg5[%c0_39, %c16, %c0_40] : memref<1x24x512xbf16, #tpu.memory_space<vmem>>, vector<1x8x512xbf16>
    %44 = vector.shape_cast %43 : vector<1x8x512xbf16> to vector<8x512xbf16>
    %45 = vector.shape_cast %42 : vector<8x512xbf16> to vector<1x8x512xbf16>
    tpu.vector_store %arg5[%c0_39, %c16, %c0_40], %45 {strides = array<i32>} : memref<1x24x512xbf16, #tpu.memory_space<vmem>>, vector<1x8x512xbf16>,
    %cst_41 = arith.constant dense<0.000000e+00> : vector<16xf32>
    %46 = vector.multi_reduction <add>, %31, %cst_41 [1] : vector<16x512xf32> to vector<16xf32>
    %47 = vector.shape_cast %46 : vector<16xf32> to vector<16x1xf32>
    %cst_42 = arith.constant dense<0.000000e+00> : vector<8xf32>
    %48 = vector.multi_reduction <add>, %37, %cst_42 [1] : vector<8x512xf32> to vector<8xf32>
    %49 = vector.shape_cast %48 : vector<8xf32> to vector<8x1xf32>
    %50 = tpu.concatenate %47, %49 in 0 : vector<16x1xf32>, vector<8x1xf32> -> vector<24x1xf32>
    %51 = arith.mulf %31, %31 : vector<16x512xf32>
    %cst_43 = arith.constant dense<0.000000e+00> : vector<16xf32>
    %52 = vector.multi_reduction <add>, %51, %cst_43 [1] : vector<16x512xf32> to vector<16xf32>
    %53 = vector.shape_cast %52 : vector<16xf32> to vector<16x1xf32>
    %54 = arith.mulf %37, %37 : vector<8x512xf32>
    %cst_44 = arith.constant dense<0.000000e+00> : vector<8xf32>
    %55 = vector.multi_reduction <add>, %54, %cst_44 [1] : vector<8x512xf32> to vector<8xf32>
    %56 = vector.shape_cast %55 : vector<8xf32> to vector<8x1xf32>
    %57 = tpu.concatenate %53, %56 in 0 : vector<16x1xf32>, vector<8x1xf32> -> vector<24x1xf32>
    %58 = tpu.concatenate %50, %57 in 1 : vector<24x1xf32>, vector<24x1xf32> -> vector<24x2xf32>
    %c0_45 = arith.constant 0 : index
    %c0_46 = arith.constant 0 : index
    %c0_47 = arith.constant 0 : index
    %59 = vector.load %arg6[%c0_45, %c0_46, %c0_47] : memref<1x24x2xf32, #tpu.memory_space<vmem>>, vector<1x24x2xf32>
    %60 = vector.shape_cast %59 : vector<1x24x2xf32> to vector<24x2xf32>
    %61 = vector.shape_cast %58 : vector<24x2xf32> to vector<1x24x2xf32>
    tpu.vector_store %arg6[%c0_45, %c0_46, %c0_47], %61 {strides = array<i32>} : memref<1x24x2xf32, #tpu.memory_space<vmem>>, vector<1x24x2xf32>,
    return
  }
  func.func @transform_0(%arg0: i32) -> (i32, i32, i32) {
    %c0_i32 = arith.constant 0 : i32
    %c0_i32_0 = arith.constant 0 : i32
    %c0_i32_1 = arith.constant 0 : i32
    return %arg0, %c0_i32, %c0_i32_0 : i32, i32, i32
  }
  func.func @transform_1(%arg0: i32) -> (i32, i32, i32) {
    %c0_i32 = arith.constant 0 : i32
    %c0_i32_0 = arith.constant 0 : i32
    %c0_i32_1 = arith.constant 0 : i32
    return %arg0, %c0_i32, %c0_i32_0 : i32, i32, i32
  }
  func.func @transform_2(%arg0: i32) -> (i32, i32, i32) {
    %c0_i32 = arith.constant 0 : i32
    %c0_i32_0 = arith.constant 0 : i32
    %c0_i32_1 = arith.constant 0 : i32
    %c0_i32_2 = arith.constant 0 : i32
    return %c0_i32, %c0_i32_0, %c0_i32_1 : i32, i32, i32
  }
  func.func @transform_3(%arg0: i32) -> (i32, i32, i32) {
    %c0_i32 = arith.constant 0 : i32
    %c0_i32_0 = arith.constant 0 : i32
    %c0_i32_1 = arith.constant 0 : i32
    %c0_i32_2 = arith.constant 0 : i32
    return %c0_i32, %c0_i32_0, %c0_i32_1 : i32, i32, i32
  }
  func.func @transform_4(%arg0: i32) -> (i32, i32, i32) {
    %c0_i32 = arith.constant 0 : i32
    %c0_i32_0 = arith.constant 0 : i32
    %c0_i32_1 = arith.constant 0 : i32
    return %arg0, %c0_i32, %c0_i32_0 : i32, i32, i32
  }
  func.func @transform_5(%arg0: i32) -> (i32, i32, i32) {
    %c0_i32 = arith.constant 0 : i32
    %c0_i32_0 = arith.constant 0 : i32
    %c0_i32_1 = arith.constant 0 : i32
    return %arg0, %c0_i32, %c0_i32_0 : i32, i32, i32
  }
}

module attributes {stable_mosaic.version = 11 : i64} {
  func.func @bn_relu_proj_kernel(%arg0: i32, %arg1: i32, %arg2: memref<1x24x512xbf16, #tpu.memory_space<vmem>>, %arg3: memref<24x1xf32, #tpu.memory_space<vmem>>, %arg4: memref<24x1xf32, #tpu.memory_space<vmem>>, %arg5: memref<8x24xf32, #tpu.memory_space<vmem>>, %arg6: memref<8x1xf32, #tpu.memory_space<vmem>>, %arg7: memref<1x8x512xf32, #tpu.memory_space<vmem>>) attributes {dimension_semantics = [#tpu.dimension_semantics<parallel>, #tpu.dimension_semantics<parallel>], iteration_bounds = array<i64: 2, 1>, scalar_prefetch = 0 : i64, scratch_operands = 0 : i64, tpu.core_type = #tpu.core_type<tc>, window_params = [{transform_indices = @transform_0, window_bounds = array<i64: 1, 24, 512>}, {pipeline_mode = #tpu.pipeline_mode<synchronous>, transform_indices = @transform_1, window_bounds = array<i64: 24, 1>}, {pipeline_mode = #tpu.pipeline_mode<synchronous>, transform_indices = @transform_2, window_bounds = array<i64: 24, 1>}, {pipeline_mode = #tpu.pipeline_mode<synchronous>, transform_indices = @transform_3, window_bounds = array<i64: 8, 24>}, {pipeline_mode = #tpu.pipeline_mode<synchronous>, transform_indices = @transform_4, window_bounds = array<i64: 8, 1>}, {transform_indices = @transform_5, window_bounds = array<i64: 1, 8, 512>}]} {
    %c0 = arith.constant 0 : index
    %c0_0 = arith.constant 0 : index
    %c0_1 = arith.constant 0 : index
    %0 = vector.load %arg2[%c0, %c0_0, %c0_1] : memref<1x24x512xbf16, #tpu.memory_space<vmem>>, vector<1x24x512xbf16>
    %1 = vector.shape_cast %0 : vector<1x24x512xbf16> to vector<24x512xbf16>
    %2 = arith.extf %1 : vector<24x512xbf16> to vector<24x512xf32>
    %c0_2 = arith.constant 0 : index
    %c0_3 = arith.constant 0 : index
    %3 = vector.load %arg3[%c0_2, %c0_3] : memref<24x1xf32, #tpu.memory_space<vmem>>, vector<24x1xf32>
    %4 = vector.broadcast %3 : vector<24x1xf32> to vector<24x512xf32>
    %5 = arith.mulf %2, %4 : vector<24x512xf32>
    %c0_4 = arith.constant 0 : index
    %c0_5 = arith.constant 0 : index
    %6 = vector.load %arg4[%c0_4, %c0_5] : memref<24x1xf32, #tpu.memory_space<vmem>>, vector<24x1xf32>
    %7 = vector.broadcast %6 : vector<24x1xf32> to vector<24x512xf32>
    %8 = arith.addf %5, %7 : vector<24x512xf32>
    %cst = arith.constant 0.000000e+00 : f32
    %9 = vector.broadcast %cst : f32 to vector<24x512xf32>
    %10 = arith.maximumf %8, %9 : vector<24x512xf32>
    %c0_6 = arith.constant 0 : index
    %c0_7 = arith.constant 0 : index
    %11 = vector.load %arg5[%c0_6, %c0_7] : memref<8x24xf32, #tpu.memory_space<vmem>>, vector<8x24xf32>
    %cst_8 = arith.constant dense<0.000000e+00> : vector<8x512xf32>
    %12 = tpu.matmul %11, %10, %cst_8 {dimension_numbers = #tpu.dot_dimension_numbers<[1], [0], [0], [1], [0, 0, 1, 1], [], []>} : vector<8x24xf32>, vector<24x512xf32>, vector<8x512xf32> -> vector<8x512xf32>
    %c0_9 = arith.constant 0 : index
    %c0_10 = arith.constant 0 : index
    %13 = vector.load %arg6[%c0_9, %c0_10] : memref<8x1xf32, #tpu.memory_space<vmem>>, vector<8x1xf32>
    %14 = vector.broadcast %13 : vector<8x1xf32> to vector<8x512xf32>
    %15 = arith.addf %12, %14 : vector<8x512xf32>
    %c0_11 = arith.constant 0 : index
    %c0_12 = arith.constant 0 : index
    %c0_13 = arith.constant 0 : index
    %16 = vector.load %arg7[%c0_11, %c0_12, %c0_13] : memref<1x8x512xf32, #tpu.memory_space<vmem>>, vector<1x8x512xf32>
    %17 = vector.shape_cast %16 : vector<1x8x512xf32> to vector<8x512xf32>
    %18 = vector.shape_cast %15 : vector<8x512xf32> to vector<1x8x512xf32>
    tpu.vector_store %arg7[%c0_11, %c0_12, %c0_13], %18 {strides = array<i32>} : memref<1x8x512xf32, #tpu.memory_space<vmem>>, vector<1x8x512xf32>,
    return
  }
  func.func @transform_0(%arg0: i32, %arg1: i32) -> (i32, i32, i32) {
    %c0_i32 = arith.constant 0 : i32
    %c0_i32_0 = arith.constant 0 : i32
    return %arg0, %c0_i32, %arg1 : i32, i32, i32
  }
  func.func @transform_1(%arg0: i32, %arg1: i32) -> (i32, i32) {
    %c0_i32 = arith.constant 0 : i32
    %c0_i32_0 = arith.constant 0 : i32
    %c0_i32_1 = arith.constant 0 : i32
    return %c0_i32, %c0_i32_0 : i32, i32
  }
  func.func @transform_2(%arg0: i32, %arg1: i32) -> (i32, i32) {
    %c0_i32 = arith.constant 0 : i32
    %c0_i32_0 = arith.constant 0 : i32
    %c0_i32_1 = arith.constant 0 : i32
    return %c0_i32, %c0_i32_0 : i32, i32
  }
  func.func @transform_3(%arg0: i32, %arg1: i32) -> (i32, i32) {
    %c0_i32 = arith.constant 0 : i32
    %c0_i32_0 = arith.constant 0 : i32
    %c0_i32_1 = arith.constant 0 : i32
    return %c0_i32, %c0_i32_0 : i32, i32
  }
  func.func @transform_4(%arg0: i32, %arg1: i32) -> (i32, i32) {
    %c0_i32 = arith.constant 0 : i32
    %c0_i32_0 = arith.constant 0 : i32
    %c0_i32_1 = arith.constant 0 : i32
    return %c0_i32, %c0_i32_0 : i32, i32
  }
  func.func @transform_5(%arg0: i32, %arg1: i32) -> (i32, i32, i32) {
    %c0_i32 = arith.constant 0 : i32
    %c0_i32_0 = arith.constant 0 : i32
    return %arg0, %c0_i32, %arg1 : i32, i32, i32
  }
}

</mosaic_0001>

<bundles_post_ra>
// kernel: double_conv1_forward.2
= control target key start
LH: loop header
LB: loop body
LE: loop exit
PB: predicated region body
PF: predicated region fallthrough
CT: control target
= control target key end

     0   :  { %s1892_s18 = smov 0   ;;  %s2141_s0 = inlined_call_operand.vmem [shape: bf16[2,36,768], index: 0, kind: input, shape index: {}]   ;;  %s2142_s1 = inlined_call_operand.vmem [shape: bf16[2,36,768], index: 1, kind: input, shape index: {}]   ;;  %s2143_s2 = inlined_call_operand.vmem [shape: bf16[3,16,36], index: 2, kind: input, shape index: {}]   ;;  %s2144_s3 = inlined_call_operand.vmem [shape: bf16[3,8,36], index: 3, kind: input, shape index: {}]   ;;  %s2145_s4 = inlined_call_operand.vmem [shape: bf16[2,24,512], index: 4, kind: output, shape index: {0}]   ;;  %s2146_s5 = inlined_call_operand.vmem [shape: f32[2,24,2], index: 5, kind: output, shape index: {1}]  }
   0x1 LB: > { %s1584_s19 = sadd.s32 4294967295, %s1857_s18   ;;  %p1588_p0 = scmp.ge.s32.totalorder %s1857_s18, 1  ;;  %s1857_s18 = sphi %s1892_s18, %s16_s18  }
   0x2   : > { %p200_p1 = scmp.lt.s32.totalorder %s1857_s18, 3 }
   0x4   : > { %p201_p2 = pnand %p1588_p0, %p200_p1 }
   0x5   : > { %p238_p3 = scmp.lt.s32.totalorder (!%p201_p2), %s1584_s19, 1  ;;  %v1859_v0 = vmov (!%p201_p2), 0   ;;  %s1860_s24 = smov (!%p201_p2), 64   ;;  %vm359_vm0 = vcmask (!%p201_p2), 1041408   ;;  %v1805_v30 = vld [vmem:[%s2143_s2 + $0x8] sm:$0xff] (!%p201_p2)   ;;  %vm355_vm1 = vcmask (!%p201_p2), 293888  }
   0x6   : > { %204 = sbr.rel (%p201_p2) target bundleno = 691 (0x2b3), region = 36  ;;  %404 = vmatprep.mubr.bf16.mxu0 (!%p201_p2), %v1859_v0  ;;  %447 = vmatprep.mubr.bf16.mxu1 (!%p201_p2), %v1859_v0  ;;  %vm548_vm2 = vcmask (!%p201_p2), 523264   ;;  %s1861_s21 = smov (!%p201_p2), 1   ;;  %vm1476_vm3 = vcmask (!%p201_p2), 7168   ;;  %vm1480_vm4 = vcmask (!%p201_p2), 15360  }
   0xd   : > { %s2148_s19 = smov (!%p238_p3, %s1584_s19), 1 }
   0xe   : > { %s1750_s20 = smul.u32 120, %s2148_s19 }
   0xf   : > { %s1751_s15 = smul.u32 48, %s2148_s19 }
  0x10   : > { %s1910_s23 = scalar_lea.vmem %s2141_s0, %s1750_s20  ;;  %s1944_s27 = scalar_lea.vmem %s2142_s1, %s1750_s20 }
  0x11   : > { %v1764_v1 = vld [vmem:[%s1910_s23 + $0x4] ss:$24 sps:$4 sm:$0xff]   ;;  %v1766_v2 = vld [vmem:[%s1910_s23] ss:$24 sps:$4 sm:$0xff]   ;;  %v1770_v5 = vld [vmem:[%s1910_s23 + $0x10] ss:$24 sps:$4 sm:$0xff]   ;;  %s2126_s20 = scalar_lea.vmem %s2145_s4, %s1751_s15 }
  0x12   : > { %520 = vrot.lane.b32.xlu0 %v1764_v1, %s1860_s24  ;;  %v1767_v3 = vld [vmem:[%s1910_s23 + $0x8] ss:$24 sps:$4 sm:$0xff]   ;;  %518 = vrot.lane.b32.xlu1 %v1766_v2, %s1860_s24  ;;  %v1769_v4 = vld [vmem:[%s1910_s23 + $0xc] ss:$24 sps:$4 sm:$0xff]   ;;  %s1752_s22 = smul.u32 24, %s2148_s19 }
  0x13   : > { %v1771_v6 = vld [vmem:[%s1910_s23 + $0x34] ss:$24 sps:$4 sm:$0xff]   ;;  %v1773_v7 = vld [vmem:[%s1910_s23 + $0x38] ss:$24 sps:$4 sm:$0xff]   ;;  %v1783_v8 = vld [vmem:[%s1910_s23 + $0x8] ss:$24 sps:$4 sm:$0xff]  }
  0x14   : > { %v1775_v9 = vld [vmem:[%s1910_s23 + $0x30] ss:$24 sps:$4 sm:$0xff]   ;;  %v1787_v10 = vld [vmem:[%s1910_s23 + $0x4] ss:$24 sps:$4 sm:$0xff]   ;;  %372 = vmatprep.subr.bf16.mxu0 %v1783_v8  ;;  %v1777_v15 = vld [vmem:[%s1910_s23 + $0x40] ss:$24 sps:$4 sm:$0xff]   ;;  %s257_s25 = scalar_lea.vmem %s2146_s5, %s1752_s22 }
  0x15   : > { %v1788_v11 = vld [vmem:[%s1910_s23 + $0x10] ss:$24 sps:$4 sm:$0xff]   ;;  %v1776_v12 = vld [vmem:[%s1910_s23 + $0x3c] ss:$24 sps:$4 sm:$0xff]   ;;  %v1785_v13 = vld [vmem:[%s1910_s23 + $0xc] ss:$24 sps:$4 sm:$0xff]   ;;  %373 = vmatpush1.bf16.msra.mxu0 %v1787_v10 }
  0x16   : > { %522 = vrot.lane.b32.xlu0 %v1767_v3, %s1860_s24  ;;  %524 = vrot.lane.b32.xlu1 %v1769_v4, %s1860_s24  ;;  %v1790_v14 = vld [vmem:[%s1910_s23 + $0x38] ss:$24 sps:$4 sm:$0xff]   ;;  %v1794_v16 = vld [vmem:[%s1910_s23 + $0x34] ss:$24 sps:$4 sm:$0xff]  }
  0x17   : > { %415 = vmatprep.subr.bf16.mxu1 %v1788_v11  ;;  %v1795_v17 = vld [vmem:[%s1910_s23 + $0x40] ss:$24 sps:$4 sm:$0xff]   ;;  %374 = vmatprep.subr.bf16.mxu0 %v1790_v14  ;;  %v1792_v19 = vld [vmem:[%s1910_s23 + $0x3c] ss:$24 sps:$4 sm:$0xff]   ;;  %v298_v20 = vld [vmem:[%s1910_s23 + $0x64] sm:$0x33] }
  0x18   : > { %416 = vmatpush1.bf16.msra.mxu1 %v1785_v13  ;;  %v273_v18 = vld [vmem:[%s1910_s23 + $0x60] sm:$0x33]  ;;  %v1605_v22 = vcombine.high %v298_v20, %v298_v20  ;;  %v1604_v23 = vcombine.low %v298_v20, %v298_v20  ;;  %v299_v24 = vld [vmem:[%s1910_s23 + $0x6c] sm:$0x33] }
  0x19   : > { %375 = vmatpush1.bf16.msra.mxu0 %v1794_v16  ;;  %417 = vmatprep.subr.bf16.mxu1 %v1795_v17  ;;  %v1623_v21 = vcombine.low %v273_v18, %v273_v18  ;;  %v1624_v25 = vcombine.high %v273_v18, %v273_v18  ;;  %v274_v26 = vld [vmem:[%s1910_s23 + $0x68] sm:$0x33]  ;;  %v1607_v27 = vcombine.high %v299_v24, %v299_v24  ;;  %v1782_v34 = vld [vmem:[%s1910_s23 + $0x70] ss:$0 sps:$4 sm:$0x33]  }
  0x1a   : > { %526 = vrot.lane.b32.xlu0 %v1770_v5, %s1860_s24  ;;  %530 = vrot.lane.b32.xlu1 %v1771_v6, %s1860_s24  ;;  %v1606_v28 = vcombine.low %v299_v24, %v299_v24  ;;  %v361_v29 = vsel %vm359_vm0, %v1604_v23, 0  ;;  %v1625_v32 = vcombine.low %v274_v26, %v274_v26  ;;  %v1626_v33 = vcombine.high %v274_v26, %v274_v26  ;;  %v1789_v35 = vld [vmem:[%s1910_s23 + $0x14] ss:$24 sps:$4 sm:$0xff]   ;;  %v991_v36 = vld [vmem:[%s1910_s23 + $0x64] sm:$0x33] }
  0x1b   : > { %1608 = vmatprep.subr.msk.bf16.mxu0 %vm359_vm0, %v1605_v22  ;;  %v1796_v37 = vld [vmem:[%s1910_s23 + $0x44] ss:$24 sps:$4 sm:$0xff]   ;;  %v1678_v38 = vcombine.low %v991_v36, %v991_v36  ;;  %v992_v39 = vld [vmem:[%s1910_s23 + $0x6c] sm:$0x33]  ;;  %v1679_v40 = vcombine.high %v991_v36, %v991_v36  ;;  %v1809_v3 = vld [vmem:[%s1944_s27 + $0x8] ss:$24 sps:$4 sm:$0xff]  }
  0x1c   : > { %418 = vmatpush1.bf16.msra.mxu1 %v1792_v19  ;;  %v367_v31 = vsel %vm359_vm0, %v1606_v28, 0  ;;  %v1680_v41 = vcombine.low %v992_v39, %v992_v39  ;;  %v1681_v42 = vcombine.high %v992_v39, %v992_v39  ;;  %v1801_v43 = vld [vmem:[%s1910_s23 + $0x74] ss:$0 sps:$4 sm:$0x33]   ;;  %v1814_v18 = vld [vmem:[%s1944_s27 + $0xc] ss:$24 sps:$4 sm:$0xff]  }
  0x1d   : > { %377 = vmatpush1.bf16.msra.mxu0 %v361_v29  ;;  %1610 = vmatprep.subr.msk.bf16.mxu1 %vm359_vm0, %v1607_v27  ;;  %v681_v24 = vld [vmem:[%s1944_s27 + $0x6c] sm:$0x33]  ;;  %v1825_v29 = vld [vmem:[%s1944_s27 + $0x4] ss:$24 sps:$4 sm:$0xff]  }
  0x1e   : > { %532 = vrot.lane.b32.xlu0 %v1773_v7, %s1860_s24  ;;  %528 = vrot.lane.b32.xlu1 %v1775_v9, %s1860_s24  ;;  %v1810_v7 = vld [vmem:[%s2143_s2] sm:$0xff]   ;;  %v1644_v28 = vcombine.high %v681_v24, %v681_v24  ;;  %v1829_v36 = vld [vmem:[%s1944_s27 + $0x34] ss:$24 sps:$4 sm:$0xff]  }
  0x1f   : > { %v1807_v9 = vld [vmem:[%s1944_s27 + $0x4] ss:$24 sps:$4 sm:$0xff]  }
  0x20   : > { %420 = vmatpush1.bf16.msra.mxu1 %v367_v31  ;;  %1609 = vmatmul.mubr.msk.bf16.vlgmr.msra.gmra.mrb[0].mxu0 %vm355_vm1, %v1805_v30  ;;  %v285_v39 = vld [vmem:[%s1944_s27 + $0x60] sm:$0x33] }
  0x21   : > { %616 = vmatprep.mubr.bf16.mxu0 %v1859_v0 }
  0x22   : > { %534 = vrot.lane.b32.xlu0 %v1776_v12, %s1860_s24  ;;  %536 = vrot.lane.b32.xlu1 %v1777_v15, %s1860_s24  ;;  %v1816_v12 = vld [vmem:[%s1944_s27 + $0x10] ss:$24 sps:$4 sm:$0xff]  }
  0x23   : > { %1611 = vmatmul.mubr.msk.bf16.vlgmr.msra.gmra.mrb[0].mxu1 %vm355_vm1, %v1805_v30  ;;  %v680_v15 = vld [vmem:[%s1944_s27 + $0x64] sm:$0x33]  ;;  %v1643_v30 = vcombine.low %v681_v24, %v681_v24 }
  0x24   : > { %659 = vmatprep.mubr.bf16.mxu1 %v1859_v0  ;;  %v1642_v20 = vcombine.high %v680_v15, %v680_v15  ;;  %v1641_v22 = vcombine.low %v680_v15, %v680_v15 }
  0x26   : > { %538 = vrot.lane.b32.xlu0 %v1623_v21, %s1860_s24  ;;  %540 = vrot.lane.b32.xlu1 %v1624_v25, %s1860_s24  ;;  %v1820_v21 = vld [vmem:[%s1944_s27 + $0x40] ss:$24 sps:$4 sm:$0xff]   ;;  %v1818_v25 = vld [vmem:[%s1944_s27 + $0x3c] ss:$24 sps:$4 sm:$0xff]   ;;  %v736_v26 = vsel %vm359_vm0, %v1641_v22, 0 }
  0x2a   : > { %542 = vrot.lane.b32.xlu0 %v1625_v32, %s1860_s24  ;;  %544 = vrot.lane.b32.xlu1 %v1626_v33, %s1860_s24  ;;  %v1823_v32 = vld [vmem:[%s1944_s27] ss:$24 sps:$4 sm:$0xff]   ;;  %v1632_v33 = vld [vmem:[%s2144_s3 + $0x4] sm:$0xf] }
  0x2e   : > { %546 = vrot.lane.b32.xlu0 %v1782_v34, %s1860_s24  ;;  %1056 = vrot.lane.b32.xlu1 %v1783_v8, %s1860_s24  ;;  %v742_v34 = vsel %vm359_vm0, %v1643_v30, 0 }
  0x32   : > { %1058 = vrot.lane.b32.xlu0 %v1785_v13, %s1860_s24  ;;  %1054 = vrot.lane.b32.xlu1 %v1787_v10, %s1860_s24 }
  0x36   : > { %1060 = vrot.lane.b32.xlu0 %v1788_v11, %s1860_s24  ;;  %1062 = vrot.lane.b32.xlu1 %v1789_v35, %s1860_s24  ;;  %v1813_v11 = vld [vmem:[%s1944_s27 + $0x38] ss:$24 sps:$4 sm:$0xff]  }
  0x3a   : > { %1066 = vrot.lane.b32.xlu0 %v1790_v14, %s1860_s24  ;;  %1068 = vrot.lane.b32.xlu1 %v1792_v19, %s1860_s24 }
  0x3e   : > { %1064 = vrot.lane.b32.xlu0 %v1794_v16, %s1860_s24  ;;  %1070 = vrot.lane.b32.xlu1 %v1795_v17, %s1860_s24  ;;  %v1811_v17 = vld [vmem:[%s1944_s27 + $0x34] ss:$24 sps:$4 sm:$0xff]  }
  0x42   : > { %1072 = vrot.lane.b32.xlu0 %v1796_v37, %s1860_s24  ;;  %1074 = vrot.lane.b32.xlu1 %v1678_v38, %s1860_s24  ;;  %v2040_v37 = vld [vmem:[%s1944_s27 + $0xc] ss:$24 sps:$4 sm:$0xff]  }
  0x46   : > { %1076 = vrot.lane.b32.xlu0 %v1679_v40, %s1860_s24  ;;  %1078 = vrot.lane.b32.xlu1 %v1680_v41, %s1860_s24  ;;  %v1827_v40 = vld [vmem:[%s1944_s27 + $0x30] ss:$24 sps:$4 sm:$0xff]  }
  0x47   : > { %v2046_v41 = vld [vmem:[%s1944_s27 + $0x8] ss:$24 sps:$4 sm:$0xff]  }
  0x4a   : > { %1080 = vrot.lane.b32.xlu0 %v1681_v42, %s1860_s24  ;;  %1082 = vrot.lane.b32.xlu1 %v1801_v43, %s1860_s24  ;;  %v1658_v43 = vcombine.high %v285_v39, %v285_v39 }
  0x84   : > { %v521_v44 = vpop.permute.xlu0 %520  ;;  %v519_v45 = vpop.permute.xlu1 %518 }
  0x85   : > { %v549_v49 = vsel %vm548_vm2, %v519_v45, %v521_v44  ;;  %v1657_v45 = vcombine.low %v285_v39, %v285_v39 }
  0x88   : > { %v523_v46 = vpop.permute.xlu0 %522  ;;  %v525_v47 = vpop.permute.xlu1 %524 }
  0x89   : > { %v550_v48 = vsel %vm548_vm2, %v521_v44, %v523_v46  ;;  %v551_v53 = vsel %vm548_vm2, %v523_v46, %v525_v47  ;;  %v2050_v44 = vld [vmem:[%s1944_s27 + $0x3c] ss:$24 sps:$4 sm:$0xff]  }
  0x8a   : > { %584 = vmatprep.subr.bf16.mxu0 %v550_v48  ;;  %v2057_v48 = vld [vmem:[%s1944_s27 + $0x38] ss:$24 sps:$4 sm:$0xff]  }
  0x8b   : > { %585 = vmatpush1.bf16.msra.mxu0 %v549_v49  ;;  %v883_v49 = vsel %vm359_vm0, %v1657_v45, 0 }
  0x8c   : > { %v527_v50 = vpop.permute.xlu0 %526  ;;  %v531_v51 = vpop.permute.xlu1 %530 }
  0x8d   : > { %v552_v52 = vsel %vm548_vm2, %v525_v47, %v527_v50  ;;  %v286_v47 = vld [vmem:[%s1944_s27 + $0x68] sm:$0x33] }
  0x8e   : > { %627 = vmatprep.subr.bf16.mxu1 %v552_v52  ;;  %v1659_v52 = vcombine.low %v286_v47, %v286_v47 }
  0x8f   : > { %628 = vmatpush1.bf16.msra.mxu1 %v551_v53 }
  0x90   : > { %v533_v54 = vpop.permute.xlu0 %532  ;;  %v529_v55 = vpop.permute.xlu1 %528 }
  0x91   : > { %v554_v56 = vsel %vm548_vm2, %v531_v51, %v533_v54  ;;  %v553_v57 = vsel %vm548_vm2, %v529_v55, %v531_v51  ;;  %v1660_v51 = vcombine.high %v286_v47, %v286_v47  ;;  %v276_v55 = vld [vmem:[%s2144_s3] sm:$0xf] }
  0x92   : > { %586 = vmatprep.subr.bf16.mxu0 %v554_v56  ;;  %v889_v56 = vsel %vm359_vm0, %v1659_v52, 0 }
  0x93   : > { %587 = vmatpush1.bf16.msra.mxu0 %v553_v57 }
  0x94   : > { %v535_v58 = vpop.permute.xlu0 %534  ;;  %v537_v60 = vpop.permute.xlu1 %536 }
  0x95   : > { %v555_v59 = vsel %vm548_vm2, %v533_v54, %v535_v58  ;;  %v556_v61 = vsel %vm548_vm2, %v535_v58, %v537_v60 }
  0x96   : > { %629 = vmatprep.subr.bf16.mxu1 %v556_v61 }
  0x97   : > { %630 = vmatpush1.bf16.msra.mxu1 %v555_v59 }
  0x98   : > { %v539_v62 = vpop.permute.xlu0 %538  ;;  %v541_v63 = vpop.permute.xlu1 %540 }
  0x99   : > { %v557_v1 = vsel %vm548_vm2, %v539_v62, %v541_v63 }
  0x9a   : > { %v573_v6 = vsel %vm359_vm0, %v557_v1, 0 }
  0x9c   : > { %v543_v2 = vpop.permute.xlu0 %542  ;;  %v545_v5 = vpop.permute.xlu1 %544 }
  0x9d   : > { %v558_v4 = vsel %vm548_vm2, %v541_v63, %v543_v2  ;;  %v559_v8 = vsel %vm548_vm2, %v543_v2, %v545_v5 }
  0x9e   : > { %1628 = vmatprep.subr.msk.bf16.mxu0 %vm359_vm0, %v558_v4  ;;  %v579_v16 = vsel %vm359_vm0, %v559_v8, 0 }
  0x9f   : > { %589 = vmatpush1.bf16.msra.mxu0 %v573_v6 }
  0xa0   : > { %v547_v10 = vpop.permute.xlu0 %546  ;;  %747 = vmatprep.subr.bf16.mxu0 %v1809_v3  ;;  %v2009_v14 = vpop.permute.xlu1 %1056 }
  0xa1   : > { %v560_v13 = vsel %vm548_vm2, %v545_v5, %v547_v10 }
  0xa2   : > { %1630 = vmatprep.subr.msk.bf16.mxu1 %vm359_vm0, %v560_v13  ;;  %1629 = vmatmul.mubr.msk.bf16.vlgmr.msra.gmra.mrb[0].mxu0 %vm355_vm1, %v1810_v7 }
  0xa3   : > { %632 = vmatpush1.bf16.msra.mxu1 %v579_v16  ;;  %748 = vmatpush1.bf16.msra.mxu0 %v1807_v9  ;;  %v1840_v9 = vld [vmem:[%s2143_s2 + $0x10] sm:$0xff]   ;;  %v1847_v16 = vld [vmem:[%s1944_s27 + $0x44] ss:$24 sps:$4 sm:$0xff]  }
  0xa4   : > { %749 = vmatprep.subr.bf16.mxu0 %v1813_v11  ;;  %788 = vmatprep.subr.bf16.mxu1 %v1816_v12  ;;  %v2017_v19 = vpop.permute.xlu0 %1058  ;;  %v2020_v23 = vpop.permute.xlu1 %1054  ;;  %v1843_v11 = vld [vmem:[%s1944_s27 + $0x14] ss:$24 sps:$4 sm:$0xff]  }
  0xa5   : > { %779 = vmatprep.mubr.bf16.mxu0 %v1859_v0  ;;  %v1085_v54 = vsel %vm548_vm2, %v2009_v14, %v2017_v19  ;;  %v1084_v58 = vsel %vm548_vm2, %v2020_v23, %v2009_v14  ;;  %v1223_v12 = vld [vmem:[%s1944_s27 + $0x68] sm:$0x33] }
  0xa6   : > { %1631 = vmatmul.mubr.msk.bf16.vlgmr.msra.gmra.mrb[0].mxu1 %vm355_vm1, %v1810_v7  ;;  %v1841_v14 = vld [vmem:[%s1944_s27 + $0x10] ss:$24 sps:$4 sm:$0xff]   ;;  %v1697_v15 = vcombine.high %v1223_v12, %v1223_v12 }
  0xa7   : > { %750 = vmatpush1.bf16.msra.mxu0 %v1811_v17  ;;  %789 = vmatpush1.bf16.msra.mxu1 %v1814_v18  ;;  %v1696_v17 = vcombine.low %v1223_v12, %v1223_v12  ;;  %v1224_v18 = vld [vmem:[%s1944_s27 + $0x70] sm:$0x33]  ;;  %v1687_v23 = vld [vmem:[%s2144_s3 + $0x8] sm:$0xf] }
  0xa8   : > { %1645 = vmatprep.subr.msk.bf16.mxu0 %vm359_vm0, %v1642_v20  ;;  %790 = vmatprep.subr.bf16.mxu1 %v1820_v21  ;;  %v2028_v27 = vpop.permute.xlu0 %1060  ;;  %v1063_v31 = vpop.permute.xlu1 %1062  ;;  %v1699_v21 = vcombine.high %v1224_v18, %v1224_v18  ;;  %v1698_v22 = vcombine.low %v1224_v18, %v1224_v18 }
  0xa9   : > { %820 = vmatprep.mubr.bf16.mxu1 %v1859_v0  ;;  %v1087_v61 = vsel %vm548_vm2, %v2028_v27, %v1063_v31  ;;  %v1086_v63 = vsel %vm548_vm2, %v2017_v19, %v2028_v27  ;;  %v1845_v19 = vld [vmem:[%s1944_s27 + $0x40] ss:$24 sps:$4 sm:$0xff]   ;;  %v1279_v20 = vsel %vm359_vm0, %v1696_v17, 0 }
  0xaa   : > { %v1285_v24 = vsel %vm359_vm0, %v1698_v22, 0 }
  0xab   : > { %752 = vmatpush1.bf16.msra.mxu0 %v736_v26  ;;  %791 = vmatpush1.bf16.msra.mxu1 %v1818_v25 }
  0xac   : > { %1647 = vmatprep.subr.msk.bf16.mxu1 %vm359_vm0, %v1644_v28  ;;  %894 = vmatprep.subr.bf16.mxu0 %v1825_v29  ;;  %v1067_v35 = vpop.permute.xlu0 %1066  ;;  %v1069_v38 = vpop.permute.xlu1 %1068 }
  0xad   : > { %v1089_v60 = vsel %vm548_vm2, %v1067_v35, %v1069_v38 }
  0xae   : > { %1646 = vmatmul.mubr.msk.bf16.vlgmr.msra.gmra.mrb[4].mxu0 %vm355_vm1, %v1632_v33 }
  0xaf   : > { %793 = vmatpush1.bf16.msra.mxu1 %v742_v34  ;;  %895 = vmatpush1.bf16.msra.mxu0 %v1823_v32 }
  0xb0   : > { %896 = vmatprep.subr.bf16.mxu0 %v1829_v36  ;;  %935 = vmatprep.subr.bf16.mxu1 %v2040_v37  ;;  %v1065_v42 = vpop.permute.xlu0 %1064  ;;  %v1071_v46 = vpop.permute.xlu1 %1070 }
  0xb1   : > { %926 = vmatprep.mubr.bf16.mxu0 %v1859_v0  ;;  %v1088_v1 = vsel %vm548_vm2, %v1065_v42, %v1067_v35  ;;  %v1090_v7 = vsel %vm548_vm2, %v1069_v38, %v1071_v46 }
  0xb2   : > { %1648 = vmatmul.mubr.msk.bf16.vlgmr.msra.gmra.mrb[4].mxu1 %vm355_vm1, %v1632_v33 }
  0xb3   : > { %897 = vmatpush1.bf16.msra.mxu0 %v1827_v40  ;;  %936 = vmatpush1.bf16.msra.mxu1 %v2046_v41 }
  0xb4   : > { %1661 = vmatprep.subr.msk.bf16.mxu0 %vm359_vm0, %v1658_v43  ;;  %937 = vmatprep.subr.bf16.mxu1 %v2050_v44  ;;  %v1073_v50 = vpop.permute.xlu0 %1072  ;;  %v1075_v53 = vpop.permute.xlu1 %1074 }
  0xb5   : > { %967 = vmatprep.mubr.bf16.mxu1 %v1859_v0  ;;  %v1091_v4 = vsel %vm548_vm2, %v1071_v46, %v1073_v50 }
  0xb7   : > { %899 = vmatpush1.bf16.msra.mxu0 %v883_v49  ;;  %938 = vmatpush1.bf16.msra.mxu1 %v2057_v48 }
  0xb8   : > { %1119 = vmatprep.subr.bf16.mxu0 %v1085_v54  ;;  %1663 = vmatprep.subr.msk.bf16.mxu1 %vm359_vm0, %v1660_v51  ;;  %v1079_v57 = vpop.permute.xlu1 %1078  ;;  %v1077_v59 = vpop.permute.xlu0 %1076 }
  0xb9   : > { %v1093_v62 = vsel %vm548_vm2, %v1077_v59, %v1079_v57  ;;  %v1092_v3 = vsel %vm548_vm2, %v1075_v53, %v1077_v59 }
  0xba   : > { %1662 = vmatmul.mubr.msk.bf16.vlgmr.msra.gmra.mrb[4].mxu0 %vm355_vm1, %v276_v55  ;;  %v1108_v8 = vsel %vm359_vm0, %v1092_v3, 0 }
  0xbb   : > { %940 = vmatpush1.bf16.msra.mxu1 %v889_v56  ;;  %1120 = vmatpush1.bf16.msra.mxu0 %v1084_v58 }
  0xbc   : > { %1121 = vmatprep.subr.bf16.mxu0 %v1089_v60  ;;  %1162 = vmatprep.subr.bf16.mxu1 %v1087_v61  ;;  %v1083_v2 = vpop.permute.xlu1 %1082  ;;  %v1081_v5 = vpop.permute.xlu0 %1080 }
  0xbd   : > { %1151 = vmatprep.mubr.bf16.mxu0 %v1859_v0  ;;  %v1095_v6 = vsel %vm548_vm2, %v1081_v5, %v1083_v2  ;;  %v1094_v10 = vsel %vm548_vm2, %v1079_v57, %v1081_v5 }
  0xbe   : > { %1664 = vmatmul.mubr.msk.bf16.vlgmr.msra.gmra.mrb[4].mxu1 %vm355_vm1, %v276_v55  ;;  %v1114_v13 = vsel %vm359_vm0, %v1094_v10, 0 }
  0xbf   : > { %1122 = vmatpush1.bf16.msra.mxu0 %v1088_v1  ;;  %1163 = vmatpush1.bf16.msra.mxu1 %v1086_v63 }
  0xc0   : > { %1164 = vmatprep.subr.bf16.mxu1 %v1091_v4  ;;  %1683 = vmatprep.subr.msk.bf16.mxu0 %vm359_vm0, %v1093_v62 }
  0xc1   : > { %1194 = vmatprep.mubr.bf16.mxu1 %v1859_v0 }
  0xc3   : > { %1124 = vmatpush1.bf16.msra.mxu0 %v1108_v8  ;;  %1165 = vmatpush1.bf16.msra.mxu1 %v1090_v7 }
  0xc4   : > { %1685 = vmatprep.subr.msk.bf16.mxu1 %vm359_vm0, %v1095_v6  ;;  %1290 = vmatprep.subr.bf16.mxu0 %v2040_v37 }
  0xc6   : > { %1684 = vmatmul.mubr.msk.bf16.vlgmr.msra.gmra.mrb[0].mxu0 %vm355_vm1, %v1840_v9 }
  0xc7   : > { %1167 = vmatpush1.bf16.msra.mxu1 %v1114_v13  ;;  %1291 = vmatpush1.bf16.msra.mxu0 %v2046_v41 }
  0xc8   : > { %1292 = vmatprep.subr.bf16.mxu0 %v2050_v44  ;;  %1331 = vmatprep.subr.bf16.mxu1 %v1843_v11 }
  0xc9   : > { %1322 = vmatprep.mubr.bf16.mxu0 %v1859_v0 }
  0xca   : > { %1686 = vmatmul.mubr.msk.bf16.vlgmr.msra.gmra.mrb[0].mxu1 %vm355_vm1, %v1840_v9 }
  0xcb   : > { %1293 = vmatpush1.bf16.msra.mxu0 %v2057_v48  ;;  %1332 = vmatpush1.bf16.msra.mxu1 %v1841_v14 }
  0xcc   : > { %1700 = vmatprep.subr.msk.bf16.mxu0 %vm359_vm0, %v1697_v15  ;;  %1333 = vmatprep.subr.bf16.mxu1 %v1847_v16 }
  0xcd   : > { %1363 = vmatprep.mubr.bf16.mxu1 %v1859_v0 }
  0xcf   : > { %1295 = vmatpush1.bf16.msra.mxu0 %v1279_v20  ;;  %1334 = vmatpush1.bf16.msra.mxu1 %v1845_v19 }
  0xd0   : > { %1702 = vmatprep.subr.msk.bf16.mxu1 %vm359_vm0, %v1699_v21 }
  0xd2   : > { %1701 = vmatmul.mubr.msk.bf16.vlgmr.msra.gmra.mrb[4].mxu0 %vm355_vm1, %v1687_v23 }
  0xd3   : > { %1336 = vmatpush1.bf16.msra.mxu1 %v1285_v24 }
  0xd6   : > { %1703 = vmatmul.mubr.msk.bf16.vlgmr.msra.gmra.mrb[4].mxu1 %vm355_vm1, %v1687_v23 }
 0x199   : > { %v1153_v25 = vpop.f32.mrb[0].mxu0 }
 0x19a   : > { %v1437_v26 = vmul.f32 %v1153_v25, %v1153_v25  ;;  %v1155_v0 = vpop.f32.mrb[1].mxu0 }
 0x19b   : > { %v1712_v27 = vpack.c.bf16 %v1155_v0, %v1153_v25  ;;  %v1422_v28 = vadd.f32 %v1155_v0, %v1153_v25  ;;  %v1438_v29 = vmul.f32 %v1155_v0, %v1155_v0  ;;  %v1157_v30 = vpop.f32.mrb[2].mxu0 }
 0x19c   : > { %v1441_v31 = vmul.f32 %v1157_v30, %v1157_v30  ;;  %v1159_v32 = vpop.f32.mrb[3].mxu0 }
 0x19d   : > { %1400 = vst [vmem:[%s2126_s20] sm:$0xff] %v1712_v27  ;;  %v1714_v33 = vpack.c.bf16 %v1159_v32, %v1157_v30  ;;  %v1427_v34 = vadd.f32 %v1159_v32, %v1157_v30  ;;  %v1442_v35 = vmul.f32 %v1159_v32, %v1159_v32  ;;  %v1196_v36 = vpop.f32.mrb[0].mxu1  ;;  %v1445_v37 = vadd.f32 %v1438_v29, %v1437_v26 }
 0x19e   : > { %v1439_v38 = vmul.f32 %v1196_v36, %v1196_v36  ;;  %v1198_v39 = vpop.f32.mrb[1].mxu1  ;;  %v1423_v40 = vadd.f32 %v1422_v28, %v1196_v36 }
 0x19f   : > { %1402 = vst [vmem:[%s2126_s20 + $0x10] sm:$0xff] %v1714_v33  ;;  %v1713_v41 = vpack.c.bf16 %v1198_v39, %v1196_v36  ;;  %v1200_v42 = vpop.f32.mrb[2].mxu1  ;;  %v1440_v43 = vmul.f32 %v1198_v39, %v1198_v39  ;;  %v1450_v44 = vadd.f32 %v1442_v35, %v1441_v31 }
 0x1a0   : > { %v1443_v45 = vmul.f32 %v1200_v42, %v1200_v42  ;;  %v1202_v46 = vpop.f32.mrb[3].mxu1  ;;  %v1446_v47 = vadd.f32 %v1445_v37, %v1439_v38  ;;  %v1428_v48 = vadd.f32 %v1427_v34, %v1200_v42  ;;  %v1424_v49 = vadd.f32 %v1423_v40, %v1198_v39 }
 0x1a1   : > { %1401 = vst [vmem:[%s2126_s20 + $0x8] sm:$0xff] %v1713_v41  ;;  %v1715_v50 = vpack.c.bf16 %v1202_v46, %v1200_v42  ;;  %v1444_v51 = vmul.f32 %v1202_v46, %v1202_v46 }
 0x1a2   : > { %v1447_v52 = vadd.f32 %v1446_v47, %v1440_v43  ;;  %v1451_v53 = vadd.f32 %v1450_v44, %v1443_v45  ;;  %v1429_v54 = vadd.f32 %v1428_v48, %v1202_v46 }
 0x1a3   : > { %1403 = vst [vmem:[%s2126_s20 + $0x18] sm:$0xff] %v1715_v50 }
 0x1a4   : > { %1448 = vadd.xlane.f32.xlu0 %v1447_v52  ;;  %v1452_v55 = vadd.f32 %v1451_v53, %v1444_v51 }
 0x1a5   : > { %v1324_v56 = vpop.f32.mrb[4].mxu0 }
 0x1a6   : > { %v1455_v57 = vmul.f32 %v1324_v56, %v1324_v56  ;;  %v1326_v58 = vpop.f32.mrb[5].mxu0  ;;  %1453 = vadd.xlane.f32.xlu1 %v1452_v55 }
 0x1a7   : > { %v1716_v59 = vpack.c.bf16 %v1326_v58, %v1324_v56  ;;  %v1432_v60 = vadd.f32 %v1326_v58, %v1324_v56  ;;  %v1456_v61 = vmul.f32 %v1326_v58, %v1326_v58  ;;  %v1328_v62 = vpop.f32.mrb[6].mxu0 }
 0x1a8   : > { %v1329_v63 = vpop.f32.mrb[7].mxu0 }
 0x1a9   : > { %1420 = vst [vmem:[%s2126_s20 + $0x20] sm:$0xff] %v1716_v59  ;;  %v1365_v1 = vpop.f32.mrb[4].mxu1  ;;  %v1459_v2 = vadd.f32 %v1456_v61, %v1455_v57 }
 0x1aa   : > { %v1457_v3 = vmul.f32 %v1365_v1, %v1365_v1  ;;  %1430 = vadd.xlane.f32.xlu1 %v1429_v54  ;;  %v1367_v4 = vpop.f32.mrb[5].mxu1  ;;  %v1433_v5 = vadd.f32 %v1432_v60, %v1365_v1 }
 0x1ab   : > { %v1717_v6 = vpack.c.bf16 %v1367_v4, %v1365_v1  ;;  %v1369_v7 = vpop.f32.mrb[6].mxu1  ;;  %v1458_v8 = vmul.f32 %v1367_v4, %v1367_v4 }
 0x1ac   : > { %v1370_v9 = vpop.f32.mrb[7].mxu1  ;;  %v1460_v10 = vadd.f32 %v1459_v2, %v1457_v3  ;;  %v1434_v11 = vadd.f32 %v1433_v5, %v1367_v4 }
 0x1ad   : > { %1421 = vst [vmem:[%s2126_s20 + $0x28] sm:$0xff] %v1717_v6 }
 0x1ae   : > { %v1461_v12 = vadd.f32 %v1460_v10, %v1458_v8 }
 0x1b0   : > { %1462 = vadd.xlane.f32.xlu0 %v1461_v12 }
 0x1b4   : > { %1425 = vadd.xlane.f32.xlu0 %v1424_v49 }
 0x1b8   : > { %1435 = vadd.xlane.f32.xlu0 %v1434_v11 }
 0x231   : > { %v1449_v13 = vpop.xlane.xlu0 %1448 }
 0x232   : > { %1467 = vrot.lane.b32.xlu1 %v1449_v13, %s1861_s21 }
 0x233   : > { %v1454_v14 = vpop.xlane.xlu1 %1453 }
 0x234   : > { %1469 = vrot.lane.b32.xlu0 %v1454_v14, %s1861_s21 }
 0x237   : > { %v1431_v17 = vpop.xlane.xlu1 %1430 }
 0x23d   : > { %v1463_v15 = vpop.xlane.xlu0 %1462 }
 0x23e   : > { %1471 = vrot.lane.b32.xlu1 %v1463_v15, %s1861_s21 }
 0x241   : > { %v1426_v16 = vpop.xlane.xlu0 %1425 }
 0x245   : > { %v1436_v18 = vpop.xlane.xlu0 %1435 }
 0x2a4   : > { %v1468_v19 = vpop.permute.xlu1 %1467 }
 0x2a5   : > { %v1477_v20 = vsel %vm1476_vm3, %v1426_v16, %v1468_v19 }
 0x2a6   : > { %1481 = vst.msk [vmem:[%s257_s25] sm:$0xff] %vm1480_vm4, %v1477_v20  ;;  %v1470_v21 = vpop.permute.xlu0 %1469 }
 0x2a7   : > { %v1478_v22 = vsel %vm1476_vm3, %v1431_v17, %v1470_v21 }
 0x2a8   : > { %1482 = vst.msk [vmem:[%s257_s25 + $0x8] sm:$0xff] %vm1480_vm4, %v1478_v22 }
 0x2b0   : > { %v1472_v23 = vpop.permute.xlu1 %1471 }
 0x2b1   : > { %v1479_v24 = vsel %vm1476_vm3, %v1436_v18, %v1472_v23 }
 0x2b2   : > { %1483 = vst.msk [vmem:[%s257_s25 + $0x10] sm:$0xff] %vm1480_vm4, %v1479_v24 }
 0x2b3 PF: > { %s16_s18 = sadd.s32 1, %s1857_s18  }
 0x2b4   : > { %p13_p4 = scmp.ge.s32.totalorder %s16_s18, 4  }
 0x2b6   :  { %15 = sbr.rel (!%p13_p4) target bundleno = 1 (0x1), region = 85 }

// kernel: double_conv1_forward.3
= control target key start
LH: loop header
LB: loop body
LE: loop exit
PB: predicated region body
PF: predicated region fallthrough
CT: control target
= control target key end

     0   :  { %s704_s18 = smov 0   ;;  %s706_s19 = smov 0   ;;  %s769_s0 = inlined_call_operand.vmem [shape: bf16[2,24,512], index: 0, kind: input, shape index: {}]   ;;  %s770_s1 = inlined_call_operand.vmem [shape: f32[24,1], index: 1, kind: input, shape index: {}]   ;;  %s771_s2 = inlined_call_operand.vmem [shape: f32[24,1], index: 2, kind: input, shape index: {}]   ;;  %s772_s3 = inlined_call_operand.vmem [shape: f32[8,24], index: 3, kind: input, shape index: {}]   ;;  %s773_s4 = inlined_call_operand.vmem [shape: f32[8,1], index: 4, kind: input, shape index: {}]   ;;  %s774_s5 = inlined_call_operand.vmem [shape: f32[2,8,512], index: 5, kind: output, shape index: {}]  }
   0x1   :  { %s708_s20 = smov 0  }
   0x2 LB: > { %s27_s21 = sadd.s32 1, %s666_s19  ;;  %p602_p0 = scmp.ge.s32.totalorder %s670_s20, 1  ;;  %s670_s20 = sphi %s708_s20, %s15_s20   ;;  %s666_s19 = sphi %s706_s19, %s776_s19   ;;  %s662_s18 = sphi %s704_s18, %s775_s18  }
   0x3   : > { %p29_p1 = scmp.ge.s32.totalorder %s27_s21, 2  ;;  %p208_p2 = scmp.lt.s32.totalorder %s670_s20, 3 }
   0x5   : > { %s778_s21 = smov (%p29_p1, %s27_s21), 0  ;;  %p209_p3 = pnand %p602_p0, %p208_p2 }
   0x6   : > { %v312_v0 = vld [vmem:[%s771_s2] sm:$0xff] (!%p209_p3)  ;;  %v672_v2 = vmov (!%p209_p3), 0   ;;  %v313_v3 = vld [vmem:[%s771_s2 + $0x8] sm:$0xff] (!%p209_p3)  ;;  %v314_v5 = vld [vmem:[%s771_s2 + $0x10] sm:$0xff] (!%p209_p3)  ;;  %v673_v8 = vmov (!%p209_p3), 0.0   ;;  %p245_p4 = scmp.lt.s32.totalorder (!%p209_p3), %s662_s18, 1 }
   0x7   : > { %212 = sbr.rel (%p209_p3) target bundleno = 371 (0x173), region = 40  ;;  %v282_v1 = vld [vmem:[%s770_s1] sm:$0xff] (!%p209_p3)  ;;  %647 = vset.pattern.permute.xlu1 (!%p209_p3), %v672_v2  ;;  %646 = vset.pattern.permute.xlu0 (!%p209_p3), %v672_v2  ;;  %v283_v4 = vld [vmem:[%s770_s1 + $0x8] sm:$0xff] (!%p209_p3)  ;;  %v284_v6 = vld [vmem:[%s770_s1 + $0x10] sm:$0xff] (!%p209_p3)  ;;  %vm361_vm0 = vcmask (!%p209_p3), 195584  }
   0x8   : > { %317 = vperm.xlu1 (!%p209_p3), %647, %v312_v0   ;;  %287 = vperm.xlu0 (!%p209_p3), %646, %v282_v1   ;;  %v355_v7 = vld [vmem:[%s773_s4] sm:$0xff] (!%p209_p3) }
   0x9   : > { %429 = vmatprep.mubr.f32.mxu0 (!%p209_p3), %v673_v8  ;;  %500 = vmatprep.mubr.f32.mxu1 (!%p209_p3), %v673_v8 }
   0xc   : > { %322 = vperm.xlu1 (!%p209_p3), %647, %v313_v3   ;;  %292 = vperm.xlu0 (!%p209_p3), %646, %v283_v4  }
   0xe   : > { %s780_s18 = smov (!%p245_p4, %s662_s18), 1 }
   0xf   : > { %s619_s11 = smul.u32 48, %s780_s18  ;;  %s610_s17 = sshll.u32 %s780_s18, 5 }
  0x10   : > { %327 = vperm.xlu1 %647, %v314_v5   ;;  %297 = vperm.xlu0 %646, %v284_v6   ;;  %s262_s24 = scalar_lea.vmem %s774_s5, %s610_s17 }
  0x11   : > { %s252_s14 = scalar_lea.vmem %s769_s0, %s619_s11 }
  0x12   : > { %v264_v9 = vld [vmem:[%s252_s14] sm:$0xff]  ;;  %v265_v10 = vld [vmem:[%s252_s14 + $0x8] sm:$0xff]  ;;  %v266_v13 = vld [vmem:[%s252_s14 + $0x10] sm:$0xff] }
  0x13   : > { %v270_v11 = vunpack.c.l.bf16 %v264_v9  ;;  %v272_v12 = vunpack.c.l.bf16 %v265_v10  ;;  %v267_v14 = vld [vmem:[%s252_s14 + $0x18] sm:$0xff]  ;;  %v271_v15 = vunpack.c.h.bf16 %v264_v9  ;;  %v273_v16 = vunpack.c.h.bf16 %v265_v10  ;;  %v268_v21 = vld [vmem:[%s252_s14 + $0x20] sm:$0xff]  ;;  %v269_v25 = vld [vmem:[%s252_s14 + $0x28] sm:$0xff] }
  0x14   : > { %358 = vperm.xlu0 %646, %v355_v7   ;;  %v274_v19 = vunpack.c.l.bf16 %v266_v13  ;;  %v276_v20 = vunpack.c.l.bf16 %v267_v14  ;;  %v275_v22 = vunpack.c.h.bf16 %v266_v13  ;;  %v277_v28 = vunpack.c.h.bf16 %v267_v14  ;;  %v354_v9 = vld [vmem:[%s772_s3] sm:$0xff] }
  0x15   : > { %v278_v29 = vunpack.c.l.bf16 %v268_v21  ;;  %v279_v30 = vunpack.c.h.bf16 %v268_v21  ;;  %v280_v34 = vunpack.c.l.bf16 %v269_v25  ;;  %v281_v40 = vunpack.c.h.bf16 %v269_v25 }
  0x87   : > { %v318_v17 = vpop.permute.xlu1 %317  ;;  %v288_v18 = vpop.permute.xlu0 %287 }
  0x88   : > { %v300_v23 = vmul.f32 %v288_v18, %v270_v11  ;;  %v302_v24 = vmul.f32 %v288_v18, %v272_v12  ;;  %v301_v26 = vmul.f32 %v288_v18, %v271_v15  ;;  %v303_v27 = vmul.f32 %v288_v18, %v273_v16 }
  0x8a   : > { %v331_v31 = vadd.f32 %v318_v17, %v301_v26  ;;  %v333_v35 = vadd.f32 %v318_v17, %v303_v27  ;;  %v330_v36 = vadd.f32 %v318_v17, %v300_v23  ;;  %v332_v37 = vadd.f32 %v318_v17, %v302_v24 }
  0x8b   : > { %v323_v32 = vpop.permute.xlu1 %322  ;;  %v293_v33 = vpop.permute.xlu0 %292 }
  0x8c   : > { %v304_v38 = vmul.f32 %v293_v33, %v274_v19  ;;  %v306_v39 = vmul.f32 %v293_v33, %v276_v20  ;;  %v305_v41 = vmul.f32 %v293_v33, %v275_v22  ;;  %v307_v42 = vmul.f32 %v293_v33, %v277_v28 }
  0x8d   : > { %v343_v44 = vmax.f32 %v331_v31, 0.0  ;;  %v345_v49 = vmax.f32 %v333_v35, 0.0  ;;  %v342_v50 = vmax.f32 %v330_v36, 0.0  ;;  %v344_v51 = vmax.f32 %v332_v37, 0.0 }
  0x8e   : > { %v335_v43 = vadd.f32 %v323_v32, %v305_v41  ;;  %v334_v45 = vadd.f32 %v323_v32, %v304_v38  ;;  %v336_v46 = vadd.f32 %v323_v32, %v306_v39  ;;  %v337_v48 = vadd.f32 %v323_v32, %v307_v42 }
  0x8f   : > { %v298_v47 = vpop.permute.xlu0 %297  ;;  %v328_v56 = vpop.permute.xlu1 %327 }
  0x90   : > { %v308_v52 = vmul.f32 %v298_v47, %v278_v29  ;;  %v309_v53 = vmul.f32 %v298_v47, %v279_v30  ;;  %v310_v54 = vmul.f32 %v298_v47, %v280_v34  ;;  %v311_v55 = vmul.f32 %v298_v47, %v281_v40 }
  0x91   : > { %v347_v57 = vmax.f32 %v335_v43, 0.0  ;;  %v349_v58 = vmax.f32 %v337_v48, 0.0  ;;  %v346_v59 = vmax.f32 %v334_v45, 0.0  ;;  %v348_v60 = vmax.f32 %v336_v46, 0.0 }
  0x92   : > { %v339_v61 = vadd.f32 %v328_v56, %v309_v53  ;;  %v341_v62 = vadd.f32 %v328_v56, %v311_v55  ;;  %v338_v5 = vadd.f32 %v328_v56, %v308_v52  ;;  %v340_v6 = vadd.f32 %v328_v56, %v310_v54 }
  0x93   : > { %v611_v63 = vpack.c.bf16 %v347_v57, %v343_v44  ;;  %v615_v0 = vpack.c.bf16 %v349_v58, %v345_v49  ;;  %v613_v1 = vpack.c.bf16 %v346_v59, %v342_v50  ;;  %v617_v2 = vpack.c.bf16 %v348_v60, %v344_v51  ;;  %v359_v10 = vpop.permute.xlu0 %358 }
  0x94   : > { %v351_v3 = vmax.f32 %v339_v61, 0.0  ;;  %v353_v4 = vmax.f32 %v341_v62, 0.0  ;;  %v350_v7 = vmax.f32 %v338_v5, 0.0  ;;  %v352_v8 = vmax.f32 %v340_v6, 0.0 }
  0x95   : > { %612 = vmatprep.subr.bf16.mxu0 %v611_v63  ;;  %616 = vmatprep.subr.bf16.mxu1 %v615_v0 }
  0x96   : > { %614 = vmatpush1.bf16.msra.mxu0 %v613_v1  ;;  %618 = vmatpush1.bf16.msra.mxu1 %v617_v2 }
  0x97   : > { %369 = vmatprep.subr.mxu0 %v351_v3  ;;  %440 = vmatprep.subr.mxu1 %v353_v4 }
  0x9a   : > { %370 = vmatpush1.msra.mxu0 %v350_v7  ;;  %441 = vmatpush1.msra.mxu1 %v352_v8 }
  0x9b   : > { %606 = vmatmul.mubr.msk.f32.vlgmr.msra.gmra.mrb[0].mxu0 %vm361_vm0, %v354_v9  ;;  %607 = vmatmul.mubr.msk.f32.vlgmr.msra.gmra.mrb[0].mxu1 %vm361_vm0, %v354_v9 }
 0x16e   : > { %v431_v11 = vpop.f32.mrb[0].mxu0  ;;  %v502_v12 = vpop.f32.mrb[0].mxu1 }
 0x16f   : > { %v432_v13 = vadd.f32 %v431_v11, %v359_v10  ;;  %v503_v14 = vadd.f32 %v502_v12, %v359_v10  ;;  %v433_v15 = vpop.f32.mrb[1].mxu0  ;;  %v504_v16 = vpop.f32.mrb[1].mxu1 }
 0x170   : > { %v434_v17 = vadd.f32 %v433_v15, %v359_v10  ;;  %v505_v18 = vadd.f32 %v504_v16, %v359_v10 }
 0x171   : > { %507 = vst [vmem:[%s262_s24] sm:$0xff] %v432_v13  ;;  %509 = vst [vmem:[%s262_s24 + $0x10] sm:$0xff] %v503_v14 }
 0x172   : > { %508 = vst [vmem:[%s262_s24 + $0x8] sm:$0xff] %v434_v17  ;;  %510 = vst [vmem:[%s262_s24 + $0x18] sm:$0xff] %v505_v18 }
 0x173 PF: > { %s15_s20 = sadd.s32 1, %s670_s20   ;;  %s775_s18 = smov %s666_s19 }
 0x174   : > { %p12_p5 = scmp.ge.s32.totalorder %s15_s20, 4   ;;  %s776_s19 = smov %s778_s21 }
 0x176   :  { %14 = sbr.rel (!%p12_p5) target bundleno = 2 (0x2), region = 70 }

</bundles_post_ra>
